<compile_context>
chip_gen: v6e
topology: v6e:2x2x1
jax: 0.10.0
libtpu: 0.0.40
codegen_flags: <defaults>
</compile_context>

<pallas_src>
import functools

import jax
import jax.numpy as jnp
import numpy as np
from jax import lax
from jax.experimental import pallas as pl
from jax.experimental.pallas import tpu as pltpu


# ------------------------- kernel 1: fused QKV projection ------------------------- #

def qkv_proj_kernel(x_ref, w_ref, q_ref, k_ref, v_ref, *, dp):
    """x_ref: (tm, E) bf16; w_ref: (E, 3*Dp) bf16 ([Wq*scale | Wk | Wv], each zero-padded
    to Dp lanes); q/k/v_ref: (tm, Dp) bf16 lane-aligned outputs."""
    qkv = jnp.dot(x_ref[...], w_ref[...], preferred_element_type=jnp.float32)  # (tm, 3*Dp)
    q_ref[...] = qkv[:, :dp].astype(q_ref.dtype)
    k_ref[...] = qkv[:, dp:2 * dp].astype(k_ref.dtype)
    v_ref[...] = qkv[:, 2 * dp:].astype(v_ref.dtype)


# ------------------------ kernel 2: causal flash attention ------------------------ #

def flash_attn_kernel(q_ref, k_ref, v_ref, o_ref, m_sc, l_sc, acc_sc, *, tq, tkv, dp):
    """One (q-tile, kv-tile) step of single-head causal attention.

    q_ref: (tq, Dp) bf16   k_ref/v_ref: (tkv, Dp) bf16   o_ref: (tq, Dp) f32
    Scratch m_sc/l_sc: (tq, 1) f32, acc_sc: (tq, Dp) f32 — persist across the kv axis.
    """
    qi = pl.program_id(1)
    ki = pl.program_id(2)

    @pl.when(ki == 0)
    def _init():
        m_sc[...] = jnp.full((tq, 1), -jnp.inf, jnp.float32)
        l_sc[...] = jnp.zeros((tq, 1), jnp.float32)
        acc_sc[...] = jnp.zeros((tq, dp), jnp.float32)

    # Skip kv tiles entirely in the causal future of this q tile (no MXU work wasted,
    # and it keeps the online softmax well-defined).
    @pl.when(ki * tkv < (qi + 1) * tq)
    def _compute():
        q = q_ref[...]                     # (tq, Dp)  bf16
        k = k_ref[...]                     # (tkv, Dp) bf16
        v = v_ref[...]                     # (tkv, Dp) bf16

        # Scores in f32 on the MXU; 1/sqrt(head_dim) is already folded into Wq.
        s = lax.dot_general(q, k, (((1,), (1,)), ((), ())),
                            preferred_element_type=jnp.float32)      # (tq, tkv)

        # In-kernel causal mask from global row/col ids (no mask operand / DMA).
        row = qi * tq + lax.broadcasted_iota(jnp.int32, (tq, tkv), 0)
        col = ki * tkv + lax.broadcasted_iota(jnp.int32, (tq, tkv), 1)
        s = jnp.where(row >= col, s, -1e30)

        # Online softmax update (all elementwise math in f32).
        m_prev = m_sc[...]
        m_new = jnp.maximum(m_prev, jnp.max(s, axis=-1, keepdims=True))
        alpha = jnp.exp(m_prev - m_new)
        p = jnp.exp(s - m_new)
        l_sc[...] = alpha * l_sc[...] + jnp.sum(p, axis=-1, keepdims=True)
        acc_sc[...] = alpha * acc_sc[...] + jnp.dot(
            p.astype(v.dtype), v, preferred_element_type=jnp.float32)
        m_sc[...] = m_new

    # TODO(synk): training-mode dropout on the attention weights is not implemented
    # (module evaluated in eval/inference mode, dropout == identity).

    @pl.when(ki == pl.num_programs(2) - 1)
    def _finalize():
        # Post-PV normalization; reciprocal goes to the EUP (approximate vrcp).
        o_ref[...] = (acc_sc[...] * pl.reciprocal(l_sc[...], approx=True)
                      ).astype(o_ref.dtype)


# ------------------------------------ wrapper -------------------------------------- #

def attention_head(x, wq, wk, wv, *, q_tile=256):
    """Forward pass of AttentionHead.  x: (B, S, E) f32; wq/wk/wv: (E, head_dim) f32."""
    B, S, E = x.shape
    D = wq.shape[1]
    BS = B * S
    Dp = ((D + 127) // 128) * 128            # lane-dense padded head dim

    # Equal q/kv tiles keep the causal block-skip test trivially correct.
    tq = min(S, q_tile)
    tkv = tq
    assert S % tq == 0, "sequence length must be a multiple of the q tile"

    # --- setup: fold 1/sqrt(D) into Wq, fuse Wq|Wk|Wv, pad to Dp lanes, cast bf16 ---
    # TODO(synk): for production D=64 on v6e/v7x, packing the weights at 3*D instead of
    # 3*Dp would avoid pushing zero lanes through the projection matmul.
    pad = ((0, 0), (0, Dp - D))
    wqkv = jnp.concatenate([jnp.pad(wq * (D ** -0.5), pad),
                            jnp.pad(wk, pad),
                            jnp.pad(wv, pad)], axis=1).astype(jnp.bfloat16)   # (E, 3*Dp)
    x2 = x.reshape(BS, E).astype(jnp.bfloat16)

    # --- projection: one wide bf16 MXU matmul, three lane-aligned outputs ---
    tm = min(BS, 256)
    assert BS % tm == 0
    q, k, v = pl.pallas_call(
        functools.partial(qkv_proj_kernel, dp=Dp),
        out_shape=tuple(jax.ShapeDtypeStruct((BS, Dp), jnp.bfloat16) for _ in range(3)),
        grid=(BS // tm,),
        in_specs=[pl.BlockSpec((tm, E), lambda i: (i, 0)),
                  pl.BlockSpec((E, 3 * Dp), lambda i: (0, 0))],
        out_specs=tuple(pl.BlockSpec((tm, Dp), lambda i: (i, 0)) for _ in range(3)),
        compiler_params=pltpu.CompilerParams(dimension_semantics=("parallel",)),
    )(x2, wqkv)

    q = q.reshape(B, S, Dp)
    k = k.reshape(B, S, Dp)
    v = v.reshape(B, S, Dp)

    # --- flash attention: grid (B, q tiles, kv tiles); kv innermost & "arbitrary" ---
    out = pl.pallas_call(
        functools.partial(flash_attn_kernel, tq=tq, tkv=tkv, dp=Dp),
        out_shape=jax.ShapeDtypeStruct((B, S, Dp), jnp.float32),
        grid_spec=pltpu.PrefetchScalarGridSpec(
            num_scalar_prefetch=0,
            grid=(B, S // tq, S // tkv),
            in_specs=[pl.BlockSpec((None, tq, Dp), lambda b, qi, ki: (b, qi, 0)),
                      pl.BlockSpec((None, tkv, Dp), lambda b, qi, ki: (b, ki, 0)),
                      pl.BlockSpec((None, tkv, Dp), lambda b, qi, ki: (b, ki, 0))],
            out_specs=pl.BlockSpec((None, tq, Dp), lambda b, qi, ki: (b, qi, 0)),
            scratch_shapes=[pltpu.VMEM((tq, 1), jnp.float32),
                            pltpu.VMEM((tq, 1), jnp.float32),
                            pltpu.VMEM((tq, Dp), jnp.float32)]),
        compiler_params=pltpu.CompilerParams(
            dimension_semantics=("parallel", "parallel", "arbitrary")),
    )(q, k, v)

    # Slice away lane padding, restore (B, S, head_dim).
    return out[..., :D]


# ------------------------------ pure-JAX reference --------------------------------- #

def _ref_attention_head(x, wq, wk, wv):
    B, S, E = x.shape
    D = wq.shape[1]
    q = x @ wq
    k = x @ wk
    v = x @ wv
    s = (q @ jnp.swapaxes(k, -1, -2)) * (D ** -0.5)
    mask = jnp.tril(jnp.ones((S, S), bool))
    s = jnp.where(mask, s, -jnp.inf)
    p = jax.nn.softmax(s, axis=-1)
    return p @ v


# ------------------------------------- main ----------------------------------------- #

if __name__ == "__main__":
    # Scaled-down shapes consistent with the module:
    # embed_size 384 -> 32, head_dim 64 -> 16, sequence_length 256 -> 8, batch = 2.
    B, S, E, D = 2, 8, 32, 16

    key = jax.random.PRNGKey(0)
    kx, kq, kk, kv = jax.random.split(key, 4)
    x = jax.random.normal(kx, (B, S, E), dtype=jnp.float32)
    wq = jax.random.normal(kq, (E, D), dtype=jnp.float32) * 0.02
    wk = jax.random.normal(kk, (E, D), dtype=jnp.float32) * 0.02
    wv = jax.random.normal(kv, (E, D), dtype=jnp.float32) * 0.02

    out = attention_head(x, wq, wk, wv)
    out = jax.block_until_ready(out)

    ref = _ref_attention_head(x, wq, wk, wv)
    assert out.shape == (B, S, D)
    # Tolerance reflects bf16 MXU operands + approximate-reciprocal softmax denominator.
    np.testing.assert_allclose(np.asarray(out), np.asarray(ref), rtol=2e-2, atol=1e-2)

    print("KERNEL_OK")
</pallas_src>

<mosaic_0001>
module attributes {stable_mosaic.version = 11 : i64} {
  func.func @qkv_proj_kernel(%arg0: i32, %arg1: memref<16x32xbf16, #tpu.memory_space<vmem>>, %arg2: memref<32x384xbf16, #tpu.memory_space<vmem>>, %arg3: memref<16x128xbf16, #tpu.memory_space<vmem>>, %arg4: memref<16x128xbf16, #tpu.memory_space<vmem>>, %arg5: memref<16x128xbf16, #tpu.memory_space<vmem>>) attributes {dimension_semantics = [#tpu.dimension_semantics<parallel>], iteration_bounds = array<i64: 1>, scalar_prefetch = 0 : i64, scratch_operands = 0 : i64, tpu.core_type = #tpu.core_type<tc>, window_params = [{transform_indices = @transform_0, window_bounds = array<i64: 16, 32>}, {pipeline_mode = #tpu.pipeline_mode<synchronous>, transform_indices = @transform_1, window_bounds = array<i64: 32, 384>}, {transform_indices = @transform_2, window_bounds = array<i64: 16, 128>}, {transform_indices = @transform_3, window_bounds = array<i64: 16, 128>}, {transform_indices = @transform_4, window_bounds = array<i64: 16, 128>}]} {
    %c0 = arith.constant 0 : index
    %c0_0 = arith.constant 0 : index
    %0 = vector.load %arg1[%c0, %c0_0] : memref<16x32xbf16, #tpu.memory_space<vmem>>, vector<16x32xbf16>
    %c0_1 = arith.constant 0 : index
    %c0_2 = arith.constant 0 : index
    %1 = vector.load %arg2[%c0_1, %c0_2] : memref<32x384xbf16, #tpu.memory_space<vmem>>, vector<32x384xbf16>
    %cst = arith.constant dense<0.000000e+00> : vector<16x384xf32>
    %2 = tpu.matmul %0, %1, %cst {dimension_numbers = #tpu.dot_dimension_numbers<[1], [0], [0], [1], [0, 0, 1, 1], [], []>} : vector<16x32xbf16>, vector<32x384xbf16>, vector<16x384xf32> -> vector<16x384xf32>
    %3 = vector.extract_strided_slice %2 {offsets = [0, 0], sizes = [16, 128], strides = [1, 1]} : vector<16x384xf32> to vector<16x128xf32>
    %4 = arith.truncf %3 : vector<16x128xf32> to vector<16x128xbf16>
    %c0_3 = arith.constant 0 : index
    %c0_4 = arith.constant 0 : index
    %5 = vector.load %arg3[%c0_3, %c0_4] : memref<16x128xbf16, #tpu.memory_space<vmem>>, vector<16x128xbf16>
    tpu.vector_store %arg3[%c0_3, %c0_4], %4 {strides = array<i32>} : memref<16x128xbf16, #tpu.memory_space<vmem>>, vector<16x128xbf16>,
    %6 = vector.extract_strided_slice %2 {offsets = [0, 128], sizes = [16, 128], strides = [1, 1]} : vector<16x384xf32> to vector<16x128xf32>
    %7 = arith.truncf %6 : vector<16x128xf32> to vector<16x128xbf16>
    %c0_5 = arith.constant 0 : index
    %c0_6 = arith.constant 0 : index
    %8 = vector.load %arg4[%c0_5, %c0_6] : memref<16x128xbf16, #tpu.memory_space<vmem>>, vector<16x128xbf16>
    tpu.vector_store %arg4[%c0_5, %c0_6], %7 {strides = array<i32>} : memref<16x128xbf16, #tpu.memory_space<vmem>>, vector<16x128xbf16>,
    %9 = vector.extract_strided_slice %2 {offsets = [0, 256], sizes = [16, 128], strides = [1, 1]} : vector<16x384xf32> to vector<16x128xf32>
    %10 = arith.truncf %9 : vector<16x128xf32> to vector<16x128xbf16>
    %c0_7 = arith.constant 0 : index
    %c0_8 = arith.constant 0 : index
    %11 = vector.load %arg5[%c0_7, %c0_8] : memref<16x128xbf16, #tpu.memory_space<vmem>>, vector<16x128xbf16>
    tpu.vector_store %arg5[%c0_7, %c0_8], %10 {strides = array<i32>} : memref<16x128xbf16, #tpu.memory_space<vmem>>, vector<16x128xbf16>,
    return
  }
  func.func @transform_0(%arg0: i32) -> (i32, i32) {
    %c0_i32 = arith.constant 0 : i32
    %c0_i32_0 = arith.constant 0 : i32
    return %arg0, %c0_i32 : i32, i32
  }
  func.func @transform_1(%arg0: i32) -> (i32, i32) {
    %c0_i32 = arith.constant 0 : i32
    %c0_i32_0 = arith.constant 0 : i32
    %c0_i32_1 = arith.constant 0 : i32
    return %c0_i32, %c0_i32_0 : i32, i32
  }
  func.func @transform_2(%arg0: i32) -> (i32, i32) {
    %c0_i32 = arith.constant 0 : i32
    %c0_i32_0 = arith.constant 0 : i32
    return %arg0, %c0_i32 : i32, i32
  }
  func.func @transform_3(%arg0: i32) -> (i32, i32) {
    %c0_i32 = arith.constant 0 : i32
    %c0_i32_0 = arith.constant 0 : i32
    return %arg0, %c0_i32 : i32, i32
  }
  func.func @transform_4(%arg0: i32) -> (i32, i32) {
    %c0_i32 = arith.constant 0 : i32
    %c0_i32_0 = arith.constant 0 : i32
    return %arg0, %c0_i32 : i32, i32
  }
}

</mosaic_0001>

<bundles_post_ra>
// kernel: tpu_custom_call.1
= control target key start
LH: loop header
LB: loop body
LE: loop exit
PB: predicated region body
PF: predicated region fallthrough
CT: control target
= control target key end

     0   :  { %10 = vsyncpa [#allocation3], 0  ;;  %s499_s0 = inlined_call_operand.hbm [shape: bf16[16,32], index: 0, kind: input, shape index: {}]   ;;  %s500_s1 = inlined_call_operand.hbm [shape: bf16[32,384], index: 1, kind: input, shape index: {}]   ;;  %s501_s2 = inlined_call_operand.hbm [shape: bf16[16,128], index: 2, kind: output, shape index: {0}]   ;;  %s502_s3 = inlined_call_operand.hbm [shape: bf16[16,128], index: 3, kind: output, shape index: {1}]   ;;  %s503_s4 = inlined_call_operand.hbm [shape: bf16[16,128], index: 4, kind: output, shape index: {2}]  }
   0x1   :  { %11 = vsyncpa [#allocation6], 0 }
   0x2   :  { %12 = vsyncpa [#allocation4], 0 }
   0x3   :  { %13 = vsyncpa [#allocation9], 0  ;;  %s435_s15 = smov [#allocation2]  }
   0x4   :  { %s19_s16 = sshll.u32 %s435_s15, 4  ;;  %s20_s16 = int_to_ptr.vmem [resolvable:$true] %s19_s16 }
   0x5   :  { %s335_s17 = scalar_lea.vmem %s20_s16, 128  ;;  %p340_p1 = scmp.lt.s32.totalorder %s20_s16, %s20_s16 }
   0x6   :  { %p336_p0 = scmp.ne.s32.totalorder %s20_s16, %s335_s17  ;;  %p341_p2 = scmp.lt.s32.totalorder %s335_s17, %s335_s17 }
   0x8   :  { %p342_p3 = por %p341_p2, %p340_p1 }
   0xa   :  { %p343_p4 = pnand %p342_p3, %p336_p0 }
   0xc   :  { %346 = shalt.err (!%p343_p4)
}
   0xd   :  { %s436_s18 = smov 64   ;;  %s437_s19 = smov 4  }
   0xe   :  { %25 = dma.hbm_to_vmem [thread:$0]  %s499_s0, 128, %s20_s16, [#allocation3], %s436_s18, %s436_s18, %s437_s19  }
   0xf   :  { %s438_s22 = smov [#allocation5]  }
  0x10   :  { %s31_s23 = sshll.u32 %s438_s22, 4  ;;  %s32_s23 = int_to_ptr.vmem [resolvable:$true] %s31_s23 }
  0x11   :  { %s355_s24 = scalar_lea.vmem %s32_s23, 768  ;;  %p360_p6 = scmp.lt.s32.totalorder %s32_s23, %s32_s23 }
  0x12   :  { %p356_p5 = scmp.ne.s32.totalorder %s32_s23, %s355_s24  ;;  %p361_p7 = scmp.lt.s32.totalorder %s355_s24, %s355_s24 }
  0x14   :  { %p362_p8 = por %p361_p7, %p360_p6 }
  0x16   :  { %p363_p9 = pnand %p362_p8, %p356_p5 }
  0x18   :  { %366 = shalt.err (!%p363_p9)
}
  0x19   :  { %s439_s25 = smov 192   ;;  %s440_s26 = smov 12  }
  0x1a   :  { %37 = dma.hbm_to_vmem [thread:$0]  %s500_s1, 768, %s32_s23, [#allocation6], %s439_s25, %s439_s25, %s440_s26  }
  0x1b   :  { %427 = dma.done.wait [#allocation3], 128  }
  0x1c   :  { %428 = vsyncadd [#allocation3], 4294967168 }
  0x1d   :  { %429 = dma.done.wait [#allocation6], 768  }
  0x1e   :  { %430 = vsyncadd [#allocation6], 4294966528  ;;  %v441_v0 = vmov 0.0   ;;  %vm442_vm0 = vmmov 0   ;;  %v443_v1 = vmov 0   ;;  %v326_v8 = vld [vmem:[#allocation2] sm:$0xff]  }
  0x1f   :  { %298 = vmatprep.subr.bf16.mxu1 %v441_v0  ;;  %302 = vmatprep.mubr.msk.bf16.mxu1 %vm442_vm0, %v441_v0  ;;  %v318_v2 = vld [vmem:[#allocation5 + $0x1c] ss:$12 sps:$4 sm:$0xff]   ;;  %v320_v3 = vld [vmem:[#allocation5 + $0x20] ss:$12 sps:$4 sm:$0xff]   ;;  %v321_v4 = vld [vmem:[#allocation5 + $0x18] ss:$12 sps:$4 sm:$0xff]  }
  0x20   :  { %128 = vmatprep.mubr.bf16.mxu0 %v443_v1  ;;  %108 = vmatprep.subr.bf16.mxu0 %v318_v2  ;;  %v322_v5 = vld [vmem:[#allocation5 + $0x4] ss:$12 sps:$4 sm:$0xff]   ;;  %v324_v6 = vld [vmem:[#allocation5 + $0x8] ss:$12 sps:$4 sm:$0xff]   ;;  %v325_v7 = vld [vmem:[#allocation5] ss:$12 sps:$4 sm:$0xff]  }
  0x21   :  { %299 = vmatpush3.bf16.msra.mxu1 %v320_v3  ;;  %109 = vmatpush1.bf16.msra.mxu0 %v321_v4  ;;  %vm92_vm1 = vcmask 261120   ;;  %s444_s0 = smov [#allocation7]   ;;  %s445_s29 = smov [#allocation8]  }
  0x22   :  { %300 = vmatprep.subr.bf16.mxu1 %v441_v0  ;;  %110 = vmatprep.subr.bf16.mxu0 %v322_v5  ;;  %s215_s1 = sshll.u32 %s444_s0, 4  ;;  %s227_s30 = sshll.u32 %s445_s29, 4  ;;  %s216_s1 = int_to_ptr.vmem [resolvable:$true] %s215_s1  ;;  %s228_s30 = int_to_ptr.vmem [resolvable:$true] %s227_s30 }
  0x23   :  { %s446_s5 = smov [#allocation10]   ;;  %s367_s7 = scalar_lea.vmem %s216_s1, 128 }
  0x24   :  { %s239_s6 = sshll.u32 %s446_s5, 4  ;;  %p368_p10 = scmp.ne.s32.totalorder %s216_s1, %s367_s7  ;;  %s240_s6 = int_to_ptr.vmem [resolvable:$true] %s239_s6 }
  0x25   :  { %301 = vmatpush3.bf16.msra.mxu1 %v324_v6  ;;  %111 = vmatpush1.bf16.msra.mxu0 %v325_v7  ;;  %p372_p11 = scmp.lt.s32.totalorder %s216_s1, %s216_s1  ;;  %p373_p12 = scmp.lt.s32.totalorder %s367_s7, %s367_s7 }
  0x27   :  { %p374_p13 = por %p373_p12, %p372_p11 }
  0x28   :  { %303 = vmatmul.mubr.msk.bf16.vlgmr.msra.gmra.mxu1 %vm92_vm1, %v326_v8  ;;  %266 = vmatmul.mubr.msk.bf16.vlgmr.msra.gmra.mxu0 %vm92_vm1, %v326_v8 }
  0x29   :  { %p375_p0 = pnand %p374_p13, %p368_p10 }
  0xe8   :  { %v173_v9 = vpop.f32.mrf.mxu1  ;;  %v130_v10 = vpop.f32.mrf.mxu0 }
  0xea   :  { %v304_v11 = vpop.f32.mrf.mxu1  ;;  %v132_v12 = vpop.f32.mrf.mxu0 }
  0xec   :  { %v176_v13 = vpop.f32.mrf.mxu1  ;;  %v134_v15 = vpop.f32.mrf.mxu0 }
  0xed   :  { %v293_v14 = vpack.c.bf16 %v176_v13, %v173_v9  ;;  %v283_v16 = vpack.c.bf16 %v134_v15, %v130_v10 }
  0xee   :  { %v305_v17 = vpop.f32.mrf.mxu1  ;;  %v136_v18 = vpop.f32.mrf.mxu0 }
  0xef   :  { %294 = vst [vmem:[#allocation10] sm:$0xff] %v293_v14   ;;  %284 = vst [vmem:[#allocation7] sm:$0xff] %v283_v16   ;;  %v288_v19 = vpack.c.bf16 %v136_v18, %v132_v12 }
  0xf0   :  { %378 = shalt.err (!%p375_p0)
}
  0xf1   :  { %221 = dma.vmem_to_hbm [thread:$0]  %s216_s1, 128, %s501_s2, [#allocation4], %s436_s18, %s436_s18, %s437_s19   ;;  %289 = vst [vmem:[#allocation8] sm:$0xff] %v288_v19  }
  0xf2   :  { %s387_s10 = scalar_lea.vmem %s228_s30, 128  ;;  %p392_p2 = scmp.lt.s32.totalorder %s228_s30, %s228_s30 }
  0xf3   :  { %p388_p1 = scmp.ne.s32.totalorder %s228_s30, %s387_s10  ;;  %p393_p3 = scmp.lt.s32.totalorder %s387_s10, %s387_s10 }
  0xf5   :  { %p394_p4 = por %p393_p3, %p392_p2 }
  0xf7   :  { %p395_p5 = pnand %p394_p4, %p388_p1 }
  0xf9   :  { %398 = shalt.err (!%p395_p5)
}
  0xfa   :  { %233 = dma.vmem_to_hbm [thread:$0]  %s228_s30, 128, %s502_s3, [#allocation9], %s436_s18, %s436_s18, %s437_s19  }
  0xfb   :  { %s407_s13 = scalar_lea.vmem %s240_s6, 128  ;;  %p412_p7 = scmp.lt.s32.totalorder %s240_s6, %s240_s6 }
  0xfc   :  { %p408_p6 = scmp.ne.s32.totalorder %s240_s6, %s407_s13  ;;  %p413_p8 = scmp.lt.s32.totalorder %s407_s13, %s407_s13 }
  0xfe   :  { %p414_p9 = por %p413_p8, %p412_p7 }
 0x100   :  { %p415_p10 = pnand %p414_p9, %p408_p6 }
 0x102   :  { %418 = shalt.err (!%p415_p10)
}
 0x103   :  { %245 = dma.vmem_to_hbm [thread:$0]  %s240_s6, 128, %s503_s4, [#allocation9], %s436_s18, %s436_s18, %s437_s19  }
 0x104   :  { %431 = dma.done.wait [#allocation4], 128  }
 0x105   :  { %432 = vsyncadd [#allocation4], 4294967168 }
 0x106   :  { %433 = dma.done.wait [#allocation9], 256  }
 0x107   :  { %434 = vsyncadd [#allocation9], 4294967040 }
 0x108   :  { %255 = vsyncpa [#allocation3], 1 }
 0x109   :  { %256 = vsyncpa [#allocation6], 1 }
 0x10a   :  { %257 = vsyncpa [#allocation4], 1 }
 0x10b   :  { %258 = vsyncpa [#allocation9], 1 }

</bundles_post_ra>
